<compile_context>
chip_gen: v7x
topology: tpu7x:2x2x1
jax: 0.10.0
libtpu: 0.0.40
codegen_flags: <defaults>
</compile_context>

<pallas_src>
import functools

import jax
import jax.numpy as jnp
from jax.experimental import pallas as pl
from jax.experimental.pallas import tpu as pltpu


def _fnet_basic_output_kernel(hs_ref, inp_ref, params_ref, out_ref, *, eps):
    # hs_ref / inp_ref / out_ref: (tile_rows, d_model)
    # params_ref:                 (2, d_model) -- row 0 = gamma, row 1 = beta
    x = hs_ref[...].astype(jnp.float32) + inp_ref[...].astype(jnp.float32)

    d = x.shape[-1]
    inv_d = jnp.float32(1.0 / d)

    # Two-pass statistics (numerically stable, biased variance == torch).
    mean = jnp.sum(x, axis=-1, keepdims=True) * inv_d           # (tile, 1)
    xc = x - mean                                               # (tile, d)
    var = jnp.sum(xc * xc, axis=-1, keepdims=True) * inv_d      # (tile, 1)
    inv_std = jax.lax.rsqrt(var + eps)                          # (tile, 1) -> EUP

    gamma = params_ref[0:1, :].astype(jnp.float32)              # (1, d)
    beta = params_ref[1:2, :].astype(jnp.float32)               # (1, d)

    # Direct normalize: no folded scale/shift temporaries.
    out_ref[...] = ((xc * inv_std) * gamma + beta).astype(out_ref.dtype)


def _round_up(x, m):
    return ((x + m - 1) // m) * m


def _tpu_generation():
    try:
        kind = jax.devices()[0].device_kind.lower()
    except Exception:
        return "unknown"
    if "v5 lite" in kind or "v5e" in kind or "v5lite" in kind:
        return "v5e"
    if "v6" in kind:
        return "v6e"
    if "v7" in kind or "7x" in kind:
        return "v7x"
    return "unknown"


# Per-generation tiling configuration.
#  v5e / v6e: 128 MiB physical VMEM -> 64 MiB scoped limit, ~24 MiB block budget.
#  v7x:        64 MiB per-TensorCore -> keep 32 MiB limit, ~12 MiB budget,
#              and demand >= 8 grid steps so each of the 2 TCs gets >= ~4
#              double-buffered steps to overlap.
_TILE_CFG = {
    "v5e": dict(vmem_limit=64 * 1024 * 1024, budget=24 * 1024 * 1024,
                max_rows=2048, min_steps=4),
    "v6e": dict(vmem_limit=64 * 1024 * 1024, budget=24 * 1024 * 1024,
                max_rows=2048, min_steps=4),
    "v7x": dict(vmem_limit=32 * 1024 * 1024, budget=12 * 1024 * 1024,
                max_rows=1024, min_steps=8),
}
_TILE_CFG_DEFAULT = dict(vmem_limit=32 * 1024 * 1024, budget=12 * 1024 * 1024,
                         max_rows=1024, min_steps=4)


def _pick_row_tile(m, d, dtype, cfg):
    """Sublane-aligned row tile under a VMEM budget, with a grid-step floor."""
    itemsize = jnp.dtype(dtype).itemsize
    # Sublane packing granularity: f32 -> 8, bf16 -> 16, int8/fp8 -> 32.
    sublane = max(8, 32 // itemsize)

    # Double-buffered pipeline blocks: (2 inputs + 1 output) x 2 buffers,
    # plus ~2 f32 (tile, d) intermediates (x, xc) inside the kernel.
    bytes_per_row = 6 * d * itemsize + 8 * d
    tile = cfg["budget"] // bytes_per_row
    tile = max(sublane, (tile // sublane) * sublane)
    tile = min(tile, cfg["max_rows"])

    # Keep enough grid steps for the double-buffer to overlap DMA with compute
    # (and, on v7x, to keep both TensorCores busy with >= 2-4 steps each).
    tile = min(tile, max(sublane, _round_up(pl.cdiv(m, cfg["min_steps"]), sublane)))
    return tile


def fnet_basic_output(hidden_states, input_tensor, gamma, beta, *, eps=1e-12,
                      row_tile=None):
    """LayerNorm(input_tensor + hidden_states) via a Pallas TPU kernel.

    hidden_states, input_tensor: (batch, seq, d_model)
    gamma, beta:                 (d_model,)
    """
    assert hidden_states.shape == input_tensor.shape
    b, s, d = hidden_states.shape
    m = b * s

    # NOTE: for best store throughput d_model should be a multiple of 128
    # (FNet's d=768 is). Non-aligned d still runs correctly via masked stores;
    # wrapper-side padding of the (m, d) streams would cost more HBM traffic
    # than the masked stores save, so we don't pad here.

    hs2 = hidden_states.reshape(m, d)
    in2 = input_tensor.reshape(m, d)
    # Single resident (2, d) parameter block: row 0 = gamma, row 1 = beta.
    params = jnp.stack(
        [gamma.reshape(d), beta.reshape(d)], axis=0
    ).astype(jnp.float32)

    gen = _tpu_generation()
    cfg = _TILE_CFG.get(gen, _TILE_CFG_DEFAULT)

    tile = row_tile if row_tile is not None else _pick_row_tile(
        m, d, hidden_states.dtype, cfg)

    kernel = functools.partial(_fnet_basic_output_kernel, eps=eps)
    grid = (pl.cdiv(m, tile),)

    in_item = jnp.dtype(hidden_states.dtype).itemsize
    out_item = in_item
    cost = pl.CostEstimate(
        flops=int(6 * m * d),                 # add, sub, 2 mul, mul, add per elem
        transcendentals=int(m),               # one rsqrt per row
        bytes_accessed=int(2 * m * d * in_item + m * d * out_item + 2 * d * 4),
    )

    out2 = pl.pallas_call(
        kernel,
        out_shape=jax.ShapeDtypeStruct((m, d), hidden_states.dtype),
        grid_spec=pltpu.PrefetchScalarGridSpec(
            num_scalar_prefetch=0,
            grid=grid,
            in_specs=[
                pl.BlockSpec((tile, d), lambda i: (i, 0)),  # hidden_states rows
                pl.BlockSpec((tile, d), lambda i: (i, 0)),  # input_tensor rows
                pl.BlockSpec((2, d), lambda i: (0, 0)),     # [gamma; beta] resident
            ],
            out_specs=pl.BlockSpec((tile, d), lambda i: (i, 0)),
        ),
        compiler_params=pltpu.CompilerParams(
            dimension_semantics=("parallel",),
            vmem_limit_bytes=cfg["vmem_limit"],
        ),
        cost_estimate=cost,
    )(hs2, in2, params)

    return out2.reshape(b, s, d)


def _reference(hidden_states, input_tensor, gamma, beta, eps):
    x = input_tensor.astype(jnp.float32) + hidden_states.astype(jnp.float32)
    mean = jnp.mean(x, axis=-1, keepdims=True)
    var = jnp.mean((x - mean) ** 2, axis=-1, keepdims=True)
    y = (x - mean) * jax.lax.rsqrt(var + eps) * gamma.astype(jnp.float32) \
        + beta.astype(jnp.float32)
    return y.astype(hidden_states.dtype)


if __name__ == "__main__":
    layer_norm_eps = 1e-12
    key = jax.random.PRNGKey(0)

    # --- Test 1: small, lane-aligned (d_model multiple of 128), f32. ---
    batch, seq, d_model = 2, 8, 128
    k_hs, k_in, key = jax.random.split(key, 3)
    hidden_states = jax.random.normal(k_hs, (batch, seq, d_model), dtype=jnp.float32)
    input_tensor = jax.random.normal(k_in, (batch, seq, d_model), dtype=jnp.float32)
    gamma = jnp.ones((d_model,), dtype=jnp.float32)
    beta = jnp.zeros((d_model,), dtype=jnp.float32)

    out = fnet_basic_output(hidden_states, input_tensor, gamma, beta,
                            eps=layer_norm_eps)
    out = jax.block_until_ready(out)
    ref = _reference(hidden_states, input_tensor, gamma, beta, layer_norm_eps)
    assert jnp.allclose(out, ref, atol=1e-5, rtol=1e-5), "f32 mismatch vs reference"

    # --- Test 2: bf16, FNet-width d=768, row count not divisible by the tile
    #             (exercises the padded trailing block and bf16 sublane packing). ---
    batch2, seq2, d_model2 = 3, 173, 768
    k_hs2, k_in2, k_g, k_b = jax.random.split(key, 4)
    hs_bf = jax.random.normal(k_hs2, (batch2, seq2, d_model2), dtype=jnp.float32)
    in_bf = jax.random.normal(k_in2, (batch2, seq2, d_model2), dtype=jnp.float32)
    hs_bf = hs_bf.astype(jnp.bfloat16)
    in_bf = in_bf.astype(jnp.bfloat16)
    gamma2 = (1.0 + 0.1 * jax.random.normal(k_g, (d_model2,))).astype(jnp.float32)
    beta2 = (0.1 * jax.random.normal(k_b, (d_model2,))).astype(jnp.float32)

    out2 = fnet_basic_output(hs_bf, in_bf, gamma2, beta2, eps=layer_norm_eps)
    out2 = jax.block_until_ready(out2)
    ref2 = _reference(hs_bf, in_bf, gamma2, beta2, layer_norm_eps)
    assert jnp.allclose(out2.astype(jnp.float32), ref2.astype(jnp.float32),
                        atol=2e-2, rtol=2e-2), "bf16 mismatch vs reference"

    print("KERNEL_OK")
</pallas_src>

<mosaic_0001>
module attributes {stable_mosaic.version = 11 : i64} {
  func.func @_fnet_basic_output_kernel(%arg0: i32, %arg1: memref<8x128xf32, #tpu.memory_space<vmem>>, %arg2: memref<8x128xf32, #tpu.memory_space<vmem>>, %arg3: memref<2x128xf32, #tpu.memory_space<vmem>>, %arg4: memref<8x128xf32, #tpu.memory_space<vmem>>) attributes {dimension_semantics = [#tpu.dimension_semantics<parallel>], iteration_bounds = array<i64: 2>, scalar_prefetch = 0 : i64, scratch_operands = 0 : i64, tpu.core_type = #tpu.core_type<tc>, window_params = [{transform_indices = @transform_0, window_bounds = array<i64: 8, 128>}, {transform_indices = @transform_1, window_bounds = array<i64: 8, 128>}, {pipeline_mode = #tpu.pipeline_mode<synchronous>, transform_indices = @transform_2, window_bounds = array<i64: 2, 128>}, {transform_indices = @transform_3, window_bounds = array<i64: 8, 128>}]} {
    %c0 = arith.constant 0 : index
    %c0_0 = arith.constant 0 : index
    %0 = vector.load %arg1[%c0, %c0_0] : memref<8x128xf32, #tpu.memory_space<vmem>>, vector<8x128xf32>
    %c0_1 = arith.constant 0 : index
    %c0_2 = arith.constant 0 : index
    %1 = vector.load %arg2[%c0_1, %c0_2] : memref<8x128xf32, #tpu.memory_space<vmem>>, vector<8x128xf32>
    %2 = arith.addf %0, %1 : vector<8x128xf32>
    %cst = arith.constant dense<0.000000e+00> : vector<8xf32>
    %3 = vector.multi_reduction <add>, %2, %cst [1] : vector<8x128xf32> to vector<8xf32>
    %4 = vector.shape_cast %3 : vector<8xf32> to vector<8x1xf32>
    %cst_3 = arith.constant 7.812500e-03 : f32
    %5 = vector.broadcast %cst_3 : f32 to vector<8x1xf32>
    %6 = arith.mulf %4, %5 : vector<8x1xf32>
    %7 = vector.broadcast %6 : vector<8x1xf32> to vector<8x128xf32>
    %8 = arith.subf %2, %7 : vector<8x128xf32>
    %9 = arith.mulf %8, %8 : vector<8x128xf32>
    %cst_4 = arith.constant dense<0.000000e+00> : vector<8xf32>
    %10 = vector.multi_reduction <add>, %9, %cst_4 [1] : vector<8x128xf32> to vector<8xf32>
    %11 = vector.shape_cast %10 : vector<8xf32> to vector<8x1xf32>
    %cst_5 = arith.constant 7.812500e-03 : f32
    %12 = vector.broadcast %cst_5 : f32 to vector<8x1xf32>
    %13 = arith.mulf %11, %12 : vector<8x1xf32>
    %cst_6 = arith.constant 9.99999996E-13 : f32
    %14 = vector.broadcast %cst_6 : f32 to vector<8x1xf32>
    %15 = arith.addf %13, %14 : vector<8x1xf32>
    %16 = math.rsqrt %15 : vector<8x1xf32>
    %c0_7 = arith.constant 0 : index
    %c0_8 = arith.constant 0 : index
    %17 = vector.load %arg3[%c0_7, %c0_8] : memref<2x128xf32, #tpu.memory_space<vmem>>, vector<1x128xf32>
    %c1 = arith.constant 1 : index
    %c0_9 = arith.constant 0 : index
    %18 = vector.load %arg3[%c1, %c0_9] : memref<2x128xf32, #tpu.memory_space<vmem>>, vector<1x128xf32>
    %19 = vector.broadcast %16 : vector<8x1xf32> to vector<8x128xf32>
    %20 = arith.mulf %8, %19 : vector<8x128xf32>
    %21 = vector.broadcast %17 : vector<1x128xf32> to vector<8x128xf32>
    %22 = arith.mulf %20, %21 : vector<8x128xf32>
    %23 = vector.broadcast %18 : vector<1x128xf32> to vector<8x128xf32>
    %24 = arith.addf %22, %23 : vector<8x128xf32>
    %c0_10 = arith.constant 0 : index
    %c0_11 = arith.constant 0 : index
    %25 = vector.load %arg4[%c0_10, %c0_11] : memref<8x128xf32, #tpu.memory_space<vmem>>, vector<8x128xf32>
    tpu.vector_store %arg4[%c0_10, %c0_11], %24 {strides = array<i32>} : memref<8x128xf32, #tpu.memory_space<vmem>>, vector<8x128xf32>,
    return
  }
  func.func @transform_0(%arg0: i32) -> (i32, i32) {
    %c0_i32 = arith.constant 0 : i32
    %c0_i32_0 = arith.constant 0 : i32
    return %arg0, %c0_i32 : i32, i32
  }
  func.func @transform_1(%arg0: i32) -> (i32, i32) {
    %c0_i32 = arith.constant 0 : i32
    %c0_i32_0 = arith.constant 0 : i32
    return %arg0, %c0_i32 : i32, i32
  }
  func.func @transform_2(%arg0: i32) -> (i32, i32) {
    %c0_i32 = arith.constant 0 : i32
    %c0_i32_0 = arith.constant 0 : i32
    %c0_i32_1 = arith.constant 0 : i32
    return %c0_i32, %c0_i32_0 : i32, i32
  }
  func.func @transform_3(%arg0: i32) -> (i32, i32) {
    %c0_i32 = arith.constant 0 : i32
    %c0_i32_0 = arith.constant 0 : i32
    return %arg0, %c0_i32 : i32, i32
  }
}

</mosaic_0001>

<bundles_post_ra>
// kernel: tpu_custom_call.1
= control target key start
LH: loop header
LB: loop body
LE: loop exit
PB: predicated region body
PF: predicated region fallthrough
CT: control target
= control target key end

     0   :  { %8 = vsyncpa [#allocation3], 0  ;;  %s802_s0 = inlined_call_operand.hbm [shape: f32[16,128], index: 0, kind: input, shape index: {}]   ;;  %s803_s1 = inlined_call_operand.hbm [shape: f32[16,128], index: 1, kind: input, shape index: {}]   ;;  %s804_s2 = inlined_call_operand.vmem [shape: f32[2,128], index: 2, kind: input, shape index: {}]   ;;  %s805_s3 = inlined_call_operand.hbm [shape: f32[16,128], index: 3, kind: output, shape index: {}]  }
   0x1   :  { %10 = vsyncpa [#allocation3 + $0x1], 0 }
   0x2   :  { %11 = vsyncpa [#allocation6], 0 }
   0x3   :  { %13 = vsyncpa [#allocation6 + $0x1], 0 }
   0x4   :  { %14 = vsyncpa [#allocation4], 0 }
   0x5   :  { %16 = vsyncpa [#allocation4 + $0x1], 0  ;;  %s582_s12 = smov 0   ;;  %s584_s13 = smov 0  }
   0x6   :  { %s586_s14 = smov 0   ;;  %s588_s15 = smov 0  }
   0x7 LB: > { %s603_s16 = sadd.s32 4294967295, %s557_s15   ;;  %s357_s17 = sadd.s32 4294967294, %s557_s15   ;;  %s557_s15 = sphi %s588_s15, %s824_s15   ;;  %s553_s14 = sphi %s586_s14, %s823_s14   ;;  %s549_s13 = sphi %s584_s13, %s822_s13   ;;  %s545_s12 = sphi %s582_s12, %s821_s12  }
   0x8   : > { %s607_s18 = sadd.s32 1, %s557_s15   ;;  %s29_s19 = sadd.s32 1, %s553_s14 }
   0x9   : > { %s26_s20 = ssub.s32 %s557_s15, %s607_s18  ;;  %p36_p0 = scmp.ne.s32.totalorder %s553_s14, %s549_s13 }
   0xa   : > { %p27_p1 = scmp.eq.s32.totalorder %s26_s20, 0  ;;  %p37_p2 = scmp.eq.s32.totalorder %s557_s15, 0 }
   0xb   : > { %p42_p3 = scmp.ne.s32.totalorder %s549_s13, %s545_s12  ;;  %p43_p4 = scmp.eq.s32.totalorder %s603_s16, 0 }
   0xc   : > { %s619_s21 = scalar_select %p27_p1, %s553_s14, %s29_s19  }
   0xd   : > { %p621_p5 = por %p37_p2, %p36_p0  ;;  %p625_p6 = por %p43_p4, %p42_p3 }
   0xe   : > { %p113_p7 = scmp.eq.s32.totalorder %s603_s16, 1  ;;  %p119_p8 = scmp.eq.s32.totalorder %s357_s17, 1 }
   0xf   : > { %s809_s23 = scalar_select %p625_p6, 1, 0 }
  0x10   : > { %p391_p10 = scmp.lt.s32.totalorder %s557_s15, 2  ;;  %p632_p11 = por %p113_p7, %p36_p0 }
  0x11   : > { %p636_p12 = por %p119_p8, %p42_p3  ;;  %s641_s26 = sand.u32 1, %s553_s14  }
  0x12   : > { %s810_s24 = scalar_select %p632_p11, 1, 0 }
  0x13   : > { %s811_s25 = scalar_select %p636_p12, 1, 0 }
  0x14   : > { %s361_s27 = sshll.u32 %s557_s15, 7  ;;  %s360_s28 = sshll.u32 %s641_s26, 3 }
  0x15   : > { %s650_s4 = scalar_lea.hbm %s802_s0, %s361_s27  ;;  %s146_s5 = scalar_lea.vmem [#allocation2], %s360_s28 }
  0x16   : > { %s153_s6 = sshll.u32 %s146_s5, 4  ;;  %p656_p13 = pnand %p391_p10, %p621_p5  ;;  %s660_s6 = int_to_ptr.vmem [resolvable:$true] %s153_s6 }
  0x17   : > { %s143_s8 = scalar_lea.sflag [#allocation3], %s641_s26  ;;  %s427_s9 = scalar_lea.hbm %s650_s4, 128 }
  0x18   : > { %p428_p2 = scmp.ne.s32.totalorder %s650_s4, %s427_s9  ;;  %p429_p3 = pneg %p656_p13 }
  0x19   : > { %s432_s17 = scalar_lea.hbm %s802_s0, 256  ;;  %p433_p5 = scmp.lt.u32.totalorder %s650_s4, %s802_s0 }
  0x1a   : > { %p430_p4 = pnand %p429_p3, %p428_p2  ;;  %p434_p8 = scmp.lt.u32.totalorder %s432_s17, %s427_s9 }
  0x1b   : > { %p436_p9 = scmp.lt.u32.totalorder %s427_s9, %s650_s4 }
  0x1c   : > { %p431_p7 = pneg %p430_p4  ;;  %p435_p10 = por %p434_p8, %p433_p5 }
  0x1e   : > { %p437_p0 = por %p436_p9, %p435_p10 }
  0x20   : > { %p438_p1 = pnand %p437_p0, %p431_p7 }
  0x22   : > { %441 = shalt.err (!%p438_p1)
}
  0x23   : > { %s442_s22 = scalar_lea.vmem %s660_s6, 128  ;;  %s559_s29 = smov [#allocation2]  }
  0x24   : > { %p443_p2 = scmp.ne.s32.totalorder %s660_s6, %s442_s22  ;;  %s447_s30 = sshll.u32 %s559_s29, 4  ;;  %s448_s30 = int_to_ptr.vmem [resolvable:$false] %s447_s30 }
  0x25   : > { %s449_s5 = scalar_lea.vmem %s448_s30, 256  ;;  %p450_p11 = scmp.lt.s32.totalorder %s660_s6, %s448_s30 }
  0x26   : > { %p445_p4 = pnand %p443_p2, %p429_p3  ;;  %p451_p5 = scmp.lt.s32.totalorder %s449_s5, %s442_s22 }
  0x28   : > { %p446_p12 = pneg %p445_p4  ;;  %p452_p8 = por %p451_p5, %p450_p11 }
  0x2a   : > { %p453_p9 = pnand %p452_p8, %p446_p12 }
  0x2c   : > { %456 = shalt.err (!%p453_p9)
}
  0x2d   : > { %383 = dma.hbm_to_vmem [thread:$0]  (!%p656_p13), %s650_s4, 128, %s660_s6, %s143_s8  }
  0x2e   : > { %p813_p0 = scmp.lt.s32.totalorder %s557_s15, 3  ;;  %p814_p1 = scmp.ge.s32.totalorder %s557_s15, 1 }
  0x2f   : > { %s703_s17 = scalar_lea.hbm %s803_s1, %s361_s27  ;;  %s164_s19 = scalar_lea.vmem [#allocation5], %s360_s28 }
  0x30   : > { %p694_p7 = pnand %p814_p1, %p813_p0  ;;  %s171_s20 = sshll.u32 %s164_s19, 4  ;;  %s172_s20 = int_to_ptr.vmem [resolvable:$true] %s171_s20 }
  0x31   : > { %s161_s4 = scalar_lea.sflag [#allocation6], %s641_s26  ;;  %s457_s6 = scalar_lea.hbm %s703_s17, 128 }
  0x32   : > { %s815_s9 = scalar_select %p694_p7, 1, 0 }
  0x33   : > { %p458_p11 = scmp.ne.s32.totalorder %s703_s17, %s457_s6  ;;  %s462_s27 = scalar_lea.hbm %s803_s1, 256 }
  0x34   : > { %p463_p2 = scmp.lt.u32.totalorder %s703_s17, %s803_s1  ;;  %p464_p4 = scmp.lt.u32.totalorder %s462_s27, %s457_s6 }
  0x35   : > { %p460_p12 = pnand %p458_p11, %p429_p3  ;;  %p466_p8 = scmp.lt.u32.totalorder %s457_s6, %s703_s17 }
  0x36   : > { %p465_p5 = por %p464_p4, %p463_p2 }
  0x37   : > { %p461_p10 = pneg %p460_p12 }
  0x38   : > { %p467_p9 = por %p466_p8, %p465_p5 }
  0x3a   : > { %p468_p0 = pnand %p467_p9, %p461_p10 }
  0x3c   : > { %471 = shalt.err (!%p468_p0)
}
  0x3d   : > { %s472_s26 = scalar_lea.vmem %s172_s20, 128  ;;  %s560_s28 = smov [#allocation5]  }
  0x3e   : > { %p473_p1 = scmp.ne.s32.totalorder %s172_s20, %s472_s26  ;;  %s477_s5 = sshll.u32 %s560_s28, 4  ;;  %s478_s5 = int_to_ptr.vmem [resolvable:$false] %s477_s5 }
  0x3f   : > { %s479_s10 = scalar_lea.vmem %s478_s5, 256  ;;  %p480_p6 = scmp.lt.s32.totalorder %s172_s20, %s478_s5 }
  0x40   : > { %p475_p11 = pnand %p473_p1, %p429_p3  ;;  %p481_p7 = scmp.lt.s32.totalorder %s479_s10, %s472_s26 }
  0x42   : > { %p476_p12 = pneg %p475_p11  ;;  %p482_p2 = por %p481_p7, %p480_p6 }
  0x44   : > { %p483_p4 = pnand %p482_p2, %p476_p12 }
  0x46   : > { %486 = shalt.err (!%p483_p4)
}
  0x47   : > { %386 = dma.hbm_to_vmem [thread:$0]  (!%p656_p13), %s703_s17, 128, %s172_s20, %s161_s4  }
  0x48   : > { %p816_p10 = scmp.ne.s32.totalorder %s815_s9, 0 }
  0x49   : > { %s730_s11 = sand.u32 (!%p816_p10), 1, %s549_s13   ;;  %p817_p6 = scmp.ne.s32.totalorder (!%p816_p10), %s809_s23, 0 }
  0x4a   : > { %180 = sbr.rel (%p816_p10) target bundleno = 412 (0x19c), region = 32  ;;  %s733_s19 = sshll.u32 (!%p816_p10), %s730_s11, 3 }
  0x4b   : > { %s183_s6 = scalar_lea.sflag (!%p816_p10), [#allocation3], %s730_s11  ;;  %s186_s8 = scalar_lea.vmem (!%p816_p10), [#allocation2], %s733_s19 }
  0x51   : > { %532 = dma.done.wait (%p817_p6), %s183_s6, 128  }
  0x52   : > { %534 = vsyncadd (%p817_p6), %s183_s6, 4294967168  ;;  %s192_s7 = scalar_lea.sflag [#allocation6], %s730_s11  ;;  %s195_s9 = scalar_lea.vmem [#allocation5], %s733_s19 }
  0x53   : > { %536 = dma.done.wait (%p817_p6), %s192_s7, 128  }
  0x54   : > { %538 = vsyncadd (%p817_p6), %s192_s7, 4294967168  ;;  %v223_v0 = vld [vmem:[%s186_s8] sm:$0xff]  ;;  %v224_v1 = vld [vmem:[%s195_s9] sm:$0xff]  ;;  %s371_s22 = sshll.u32 %s603_s16, 7  ;;  %s222_s27 = scalar_lea.vmem [#allocation7], %s733_s19 }
  0x55   : > { %v225_v2 = vadd.f32 %v224_v1, %v223_v0  ;;  %v368_v11 = vld [vmem:[%s804_s2] ss:$0 sm:$0xff]  ;;  %v369_v13 = vld [vmem:[%s804_s2 + $0x1] ss:$0 sm:$0xff]  ;;  %s264_s29 = sshll.u32 %s222_s27, 4  ;;  %s758_s28 = scalar_lea.hbm %s805_s3, %s371_s22  ;;  %s760_s29 = int_to_ptr.vmem [resolvable:$true] %s264_s29 }
  0x56   : > { %s251_s5 = scalar_lea.sflag [#allocation4], %s730_s11  ;;  %s487_s10 = scalar_lea.vmem %s760_s29, 128 }
  0x57   : > { %226 = vadd.xlane.f32.xlu0 %v225_v2  ;;  %p488_p13 = scmp.ne.s32.totalorder %s760_s29, %s487_s10  ;;  %p818_p3 = scmp.ne.s32.totalorder %s810_s24, 0 }
  0x58   : > { %s561_s16 = smov [#allocation7]  }
  0x59   : > { %p489_p7 = pnand %p488_p13, %p818_p3  ;;  %s491_s19 = sshll.u32 %s561_s16, 4  ;;  %s492_s19 = int_to_ptr.vmem [resolvable:$false] %s491_s19 }
  0x5a   : > { %s493_s6 = scalar_lea.vmem %s492_s19, 256  ;;  %p494_p8 = scmp.lt.s32.totalorder %s760_s29, %s492_s19 }
  0x5b   : > { %p490_p5 = pneg %p489_p7  ;;  %p495_p9 = scmp.lt.s32.totalorder %s493_s6, %s487_s10 }
  0x5d   : > { %p496_p0 = por %p495_p9, %p494_p8 }
  0x5f   : > { %p497_p1 = pnand %p496_p0, %p490_p5 }
  0xe4   : > { %v227_v3 = vpop.xlane.xlu0 %226 }
  0xe5   : > { %v228_v4 = vmul.f32 0.0078125, %v227_v3 }
  0xe7   : > { %v229_v5 = vsub.f32 %v225_v2, %v228_v4 }
  0xe9   : > { %v230_v6 = vmul.f32 %v229_v5, %v229_v5 }
  0xeb   : > { %231 = vadd.xlane.f32.xlu0 %v230_v6 }
 0x178   : > { %v232_v7 = vpop.xlane.xlu0 %231 }
 0x179   : > { %v233_v8 = vmul.f32 0.0078125, %v232_v7 }
 0x17b   : > { %v234_v9 = vadd.f32 1e-12, %v233_v8 }
 0x17d   : > { %425 = vrsqrt.f32 %v234_v9 }
 0x187   : > { %v426_v10 = vpop.eup %425 }
 0x188   : > { %v238_v12 = vmul.f32 %v426_v10, %v229_v5 }
 0x18a   : > { %v243_v14 = vmul.f32 %v368_v11, %v238_v12 }
 0x18c   : > { %v248_v15 = vadd.f32 %v369_v13, %v243_v14 }
 0x18e   : > { %249 = vst [vmem:[%s222_s27] sm:$0xff] %v248_v15 }
 0x18f   : > { %500 = shalt.err (!%p497_p1)
}
 0x190   : > { %s501_s11 = scalar_lea.hbm %s758_s28, 128  ;;  %s505_s9 = scalar_lea.hbm %s805_s3, 256 }
 0x191   : > { %p502_p11 = scmp.ne.s32.totalorder %s758_s28, %s501_s11  ;;  %p506_p4 = scmp.lt.u32.totalorder %s758_s28, %s805_s3 }
 0x192   : > { %p507_p10 = scmp.lt.u32.totalorder %s505_s9, %s501_s11  ;;  %p509_p13 = scmp.lt.u32.totalorder %s501_s11, %s758_s28 }
 0x193   : > { %p503_p12 = pnand %p502_p11, %p818_p3 }
 0x194   : > { %p508_p6 = por %p507_p10, %p506_p4 }
 0x195   : > { %p504_p2 = pneg %p503_p12 }
 0x196   : > { %p510_p7 = por %p509_p13, %p508_p6 }
 0x198   : > { %p511_p5 = pnand %p510_p7, %p504_p2 }
 0x19a   : > { %514 = shalt.err (!%p511_p5)
}
 0x19b   : > { %378 = dma.vmem_to_hbm [thread:$0]  (%p818_p3), %s760_s29, 128, %s758_s28, %s251_s5  }
 0x19c PF: > { %s276_s20 = sand.u32 1, %s545_s12   ;;  %p819_p8 = scmp.ne.s32.totalorder %s811_s25, 0 }
 0x19d   : > { %p820_p9 = scmp.ge.s32.totalorder %s557_s15, 2  ;;  %s277_s4 = scalar_lea.sflag [#allocation4], %s276_s20 }
 0x19f   : > { %p388_p0 = pnand %p820_p9, %p819_p8 }
 0x1a1   : > { %540 = dma.done.wait (!%p388_p0), %s277_s4, 128  }
 0x1a2   : > { %542 = vsyncadd (!%p388_p0), %s277_s4, 4294967168  ;;  %p19_p1 = scmp.ge.s32.totalorder %s607_s18, 4   ;;  %s821_s12 = smov %s549_s13 }
 0x1a3   : > { %s822_s13 = smov %s553_s14  ;;  %s823_s14 = smov %s619_s21 }
 0x1a4   : > { %s824_s15 = smov %s607_s18  ;;  %21 = sbr.rel (!%p19_p1) target bundleno = 7 (0x7), region = 90 }
 0x1ab   :  { %282 = vsyncpa [#allocation3], 1 }
 0x1ac   :  { %284 = vsyncpa [#allocation3 + $0x1], 1 }
 0x1ad   :  { %285 = vsyncpa [#allocation6], 1 }
 0x1ae   :  { %287 = vsyncpa [#allocation6 + $0x1], 1 }
 0x1af   :  { %288 = vsyncpa [#allocation4], 1 }
 0x1b0   :  { %290 = vsyncpa [#allocation4 + $0x1], 1 }

</bundles_post_ra>
